<compile_context>
chip_gen: v5e
topology: v5e:2x2
jax: 0.10.0
libtpu: 0.0.40
codegen_flags: <defaults>
</compile_context>

<pallas_src>
import functools

import jax
import jax.numpy as jnp
from jax.experimental import pallas as pl
from jax.experimental.pallas import tpu as pltpu


def _round_up(x, m):
    return ((x + m - 1) // m) * m


def _pick_hw_tile(hw, max_tile=512):
    """Largest tile <= max_tile that divides HW and is a multiple of 16."""
    if hw <= max_tile:
        return hw
    t = (max_tile // 16) * 16
    while t >= 16:
        if hw % t == 0:
            return t
        t -= 16
    return hw  # fallback: single full tile (block == array dim is legal)


# ---------------------------------------------------------------------------
# Fused Pallas kernel: conv(as matmul) + ReLU + global-avg-pool + Linear embed
# ---------------------------------------------------------------------------
def _fused_encoder_kernel(inv_hw,
                          patches_ref, cw_ref, cb_ref, ew_ref, eb_ref,
                          out_ref, acc_ref):
    """Grid = (B, HW_tiles).

    patches: (1, TILE_HW, K_pad)  bf16 im2col rows of one image tile
    cw:      (K_pad, Cout)        bf16 conv weights (resident across grid)
    cb:      (1, Cout)            f32  conv bias (resident)
    ew:      (Cout, E_pad)        f32  embed weights (resident)
    eb:      (1, E_pad)           f32  embed bias (resident)
    out:     (1, 1, E_pad)        f32, written once at the last HW tile
    acc:     (1, Cout)            f32  running pooled sum for this image
    """
    t = pl.program_id(1)

    @pl.when(t == 0)
    def _():
        acc_ref[...] = jnp.zeros_like(acc_ref)

    # conv stage: bf16 MXU matmul, f32 accumulate; bias + ReLU in f32 (VPU).
    x = patches_ref[0]                                           # (TILE_HW, K_pad)
    feat = jnp.dot(x, cw_ref[...], preferred_element_type=jnp.float32)
    feat = jnp.maximum(feat + cb_ref[...], 0.0)                  # (TILE_HW, Cout)

    # AdaptiveAvgPool2d((1,1)) folded into the grid reduction axis:
    acc_ref[...] += jnp.sum(feat, axis=0, keepdims=True)         # (1, Cout)

    @pl.when(t == pl.num_programs(1) - 1)
    def _():
        pooled = acc_ref[...] * inv_hw                           # mean over H*W
        emb = jnp.dot(pooled, ew_ref[...],
                      preferred_element_type=jnp.float32) + eb_ref[...]
        out_ref[...] = emb[None]                                 # (1, 1, E_pad)


# ---------------------------------------------------------------------------
# pallas_call plumbing
# ---------------------------------------------------------------------------
def _fused_encoder(patches, conv_w, conv_b, embed_w, embed_b, hw, hw_tile):
    B, HW, K_pad = patches.shape
    Cout = conv_w.shape[1]
    E_pad = embed_w.shape[1]
    n_hw_tiles = HW // hw_tile

    flops = 2 * B * HW * K_pad * Cout + 2 * B * Cout * E_pad
    bytes_accessed = (patches.size * patches.dtype.itemsize
                      + conv_w.size * conv_w.dtype.itemsize
                      + conv_b.size * 4 + embed_w.size * 4 + embed_b.size * 4
                      + B * E_pad * 4)

    kernel = functools.partial(_fused_encoder_kernel, 1.0 / float(hw))

    out = pl.pallas_call(
        kernel,
        out_shape=jax.ShapeDtypeStruct((B, 1, E_pad), jnp.float32),
        grid_spec=pltpu.PrefetchScalarGridSpec(
            num_scalar_prefetch=0,
            grid=(B, n_hw_tiles),
            in_specs=[
                pl.BlockSpec((1, hw_tile, K_pad), lambda b, t: (b, t, 0)),
                pl.BlockSpec((K_pad, Cout), lambda b, t: (0, 0)),
                pl.BlockSpec((1, Cout), lambda b, t: (0, 0)),
                pl.BlockSpec((Cout, E_pad), lambda b, t: (0, 0)),
                pl.BlockSpec((1, E_pad), lambda b, t: (0, 0)),
            ],
            out_specs=pl.BlockSpec((1, 1, E_pad), lambda b, t: (b, 0, 0)),
            scratch_shapes=[pltpu.VMEM((1, Cout), jnp.float32)],
        ),
        compiler_params=pltpu.CompilerParams(
            dimension_semantics=("parallel", "arbitrary")),
        cost_estimate=pl.CostEstimate(flops=int(flops),
                                      transcendentals=0,
                                      bytes_accessed=int(bytes_accessed)),
    )(patches, conv_w, conv_b, embed_w, embed_b)
    return out[:, 0, :]                                          # (B, E_pad)


def _im2col_3x3_same(x_nhwc):
    """3x3, stride 1, padding 1 patches.  Pure data rearrangement (glue)."""
    B, H, W, C = x_nhwc.shape
    xp = jnp.pad(x_nhwc, ((0, 0), (1, 1), (1, 1), (0, 0)))
    cols = []
    for dy in range(3):
        for dx in range(3):
            cols.append(xp[:, dy:dy + H, dx:dx + W, :])
    patches = jnp.stack(cols, axis=3)                            # (B, H, W, 9, C)
    return patches.reshape(B, H * W, 9 * C)


def encoder_cnn_forward(images_nchw, conv_w, conv_b, embed_w, embed_b,
                        hw_tile=None):
    """images: (B, Cin, H, W) f32 (NCHW, as in PyTorch) -> (B, embed_size)."""
    B, Cin, H, W = images_nchw.shape
    K = conv_w.shape[0]
    E = embed_w.shape[1]
    assert K == 9 * Cin

    # Boundary glue (data movement only):
    x = jnp.transpose(images_nchw, (0, 2, 3, 1))                 # NCHW -> NHWC
    patches = _im2col_3x3_same(x)                                # (B, HW, 9*Cin)

    # Pad contraction dim and embed dim to lane-dense multiples of 128.
    K_pad = _round_up(K, 128)
    E_pad = _round_up(E, 128)
    patches = jnp.pad(
        patches, ((0, 0), (0, 0), (0, K_pad - K))).astype(jnp.bfloat16)
    conv_w_p = jnp.pad(conv_w, ((0, K_pad - K), (0, 0))).astype(jnp.bfloat16)
    embed_w_p = jnp.pad(embed_w, ((0, 0), (0, E_pad - E)))
    embed_b_p = jnp.pad(embed_b, ((0, 0), (0, E_pad - E)))

    HW = H * W
    if hw_tile is None:
        hw_tile = _pick_hw_tile(HW)

    out = _fused_encoder(patches, conv_w_p, conv_b, embed_w_p, embed_b_p,
                         HW, hw_tile)
    return out[:, :E]                                            # strip E padding


# ---------------------------------------------------------------------------
# Pure-JAX reference (matches kernel's bf16-matmul / f32-accumulate recipe)
# ---------------------------------------------------------------------------
def _reference(images_nchw, conv_w, conv_b, embed_w, embed_b):
    x = jnp.transpose(images_nchw, (0, 2, 3, 1))
    patches = _im2col_3x3_same(x)                                # (B, HW, K)
    feat = jnp.einsum("bpk,kc->bpc",
                      patches.astype(jnp.bfloat16),
                      conv_w.astype(jnp.bfloat16),
                      preferred_element_type=jnp.float32)
    feat = jnp.maximum(feat + conv_b, 0.0)
    pooled = feat.mean(axis=1)                                   # (B, Cout)
    return pooled @ embed_w + embed_b


if __name__ == "__main__":
    key = jax.random.PRNGKey(0)
    B, Cin, H, W = 2, 3, 16, 16
    feat_c = 128        # stand-in for resnet.fc.in_features (2048 in ResNet-50)
    embed_size = 32

    k1, k2, k3, k4, k5 = jax.random.split(key, 5)
    images = jax.random.normal(k1, (B, Cin, H, W), jnp.float32)          # NCHW
    # conv weight stored pre-flattened as (KH*KW*Cin, Cout)
    conv_w = jax.random.normal(k2, (3 * 3 * Cin, feat_c), jnp.float32) * 0.1
    conv_b = jax.random.normal(k3, (1, feat_c), jnp.float32) * 0.1
    # Linear stored as (in_features, out_features)  (PyTorch keeps (out, in))
    embed_w = jax.random.normal(k4, (feat_c, embed_size), jnp.float32) * 0.1
    embed_b = jax.random.normal(k5, (1, embed_size), jnp.float32) * 0.1

    # hw_tile=128 -> grid (B, 2): exercises the accumulator init/finalize path.
    out = encoder_cnn_forward(images, conv_w, conv_b, embed_w, embed_b,
                              hw_tile=128)
    out = jax.block_until_ready(out)

    ref = _reference(images, conv_w, conv_b, embed_w, embed_b)
    assert out.shape == (B, embed_size), out.shape
    assert out.dtype == jnp.float32
    assert jnp.allclose(out, ref, atol=1e-3, rtol=1e-3), \
        float(jnp.max(jnp.abs(out - ref)))

    print("KERNEL_OK")
</pallas_src>

<mosaic_0001>
module attributes {stable_mosaic.version = 11 : i64} {
  func.func @_fused_encoder_kernel(%arg0: i32, %arg1: i32, %arg2: memref<1x128x128xbf16, #tpu.memory_space<vmem>>, %arg3: memref<128x128xbf16, #tpu.memory_space<vmem>>, %arg4: memref<1x128xf32, #tpu.memory_space<vmem>>, %arg5: memref<128x128xf32, #tpu.memory_space<vmem>>, %arg6: memref<1x128xf32, #tpu.memory_space<vmem>>, %arg7: memref<1x1x128xf32, #tpu.memory_space<vmem>>, %arg8: memref<1x128xf32, #tpu.memory_space<vmem>>) attributes {dimension_semantics = [#tpu.dimension_semantics<parallel>, #tpu.dimension_semantics<arbitrary>], iteration_bounds = array<i64: 2, 2>, scalar_prefetch = 0 : i64, scratch_operands = 1 : i64, tpu.core_type = #tpu.core_type<tc>, window_params = [{transform_indices = @transform_0, window_bounds = array<i64: 1, 128, 128>}, {pipeline_mode = #tpu.pipeline_mode<synchronous>, transform_indices = @transform_1, window_bounds = array<i64: 128, 128>}, {pipeline_mode = #tpu.pipeline_mode<synchronous>, transform_indices = @transform_2, window_bounds = array<i64: 1, 128>}, {pipeline_mode = #tpu.pipeline_mode<synchronous>, transform_indices = @transform_3, window_bounds = array<i64: 128, 128>}, {pipeline_mode = #tpu.pipeline_mode<synchronous>, transform_indices = @transform_4, window_bounds = array<i64: 1, 128>}, {transform_indices = @transform_5, window_bounds = array<i64: 1, 1, 128>}]} {
    %c0_i32 = arith.constant 0 : i32
    %0 = arith.cmpi eq, %arg1, %c0_i32 : i32
    %1 = arith.extui %0 : i1 to i32
    %c0_i32_0 = arith.constant 0 : i32
    %2 = arith.cmpi ne, %1, %c0_i32_0 : i32
    scf.if %2 {
      %cst_14 = arith.constant 0.000000e+00 : f32
      %20 = vector.broadcast %cst_14 : f32 to vector<1x128xf32>
      %c0_15 = arith.constant 0 : index
      %c0_16 = arith.constant 0 : index
      %21 = vector.load %arg8[%c0_15, %c0_16] : memref<1x128xf32, #tpu.memory_space<vmem>>, vector<1x128xf32>
      tpu.vector_store %arg8[%c0_15, %c0_16], %20 {strides = array<i32>} : memref<1x128xf32, #tpu.memory_space<vmem>>, vector<1x128xf32>,
    } else {
    }
    %c0 = arith.constant 0 : index
    %c0_1 = arith.constant 0 : index
    %c0_2 = arith.constant 0 : index
    %3 = vector.load %arg2[%c0, %c0_1, %c0_2] : memref<1x128x128xbf16, #tpu.memory_space<vmem>>, vector<1x128x128xbf16>
    %4 = vector.shape_cast %3 : vector<1x128x128xbf16> to vector<128x128xbf16>
    %c0_3 = arith.constant 0 : index
    %c0_4 = arith.constant 0 : index
    %5 = vector.load %arg3[%c0_3, %c0_4] : memref<128x128xbf16, #tpu.memory_space<vmem>>, vector<128x128xbf16>
    %cst = arith.constant dense<0.000000e+00> : vector<128x128xf32>
    %6 = tpu.matmul %4, %5, %cst {dimension_numbers = #tpu.dot_dimension_numbers<[1], [0], [0], [1], [0, 0, 1, 1], [], []>} : vector<128x128xbf16>, vector<128x128xbf16>, vector<128x128xf32> -> vector<128x128xf32>
    %c0_5 = arith.constant 0 : index
    %c0_6 = arith.constant 0 : index
    %7 = vector.load %arg4[%c0_5, %c0_6] : memref<1x128xf32, #tpu.memory_space<vmem>>, vector<1x128xf32>
    %8 = vector.broadcast %7 : vector<1x128xf32> to vector<128x128xf32>
    %9 = arith.addf %6, %8 : vector<128x128xf32>
    %cst_7 = arith.constant 0.000000e+00 : f32
    %10 = vector.broadcast %cst_7 : f32 to vector<128x128xf32>
    %11 = arith.maximumf %9, %10 : vector<128x128xf32>
    %c0_8 = arith.constant 0 : index
    %c0_9 = arith.constant 0 : index
    %12 = vector.load %arg8[%c0_8, %c0_9] : memref<1x128xf32, #tpu.memory_space<vmem>>, vector<1x128xf32>
    %cst_10 = arith.constant dense<0.000000e+00> : vector<128xf32>
    %13 = vector.multi_reduction <add>, %11, %cst_10 [0] : vector<128x128xf32> to vector<128xf32>
    %14 = vector.shape_cast %13 : vector<128xf32> to vector<1x128xf32>
    %15 = arith.addf %12, %14 : vector<1x128xf32>
    %c0_11 = arith.constant 0 : index
    %c0_12 = arith.constant 0 : index
    %16 = vector.load %arg8[%c0_11, %c0_12] : memref<1x128xf32, #tpu.memory_space<vmem>>, vector<1x128xf32>
    tpu.vector_store %arg8[%c0_11, %c0_12], %15 {strides = array<i32>} : memref<1x128xf32, #tpu.memory_space<vmem>>, vector<1x128xf32>,
    %c1_i32 = arith.constant 1 : i32
    %17 = arith.cmpi eq, %arg1, %c1_i32 : i32
    %18 = arith.extui %17 : i1 to i32
    %c0_i32_13 = arith.constant 0 : i32
    %19 = arith.cmpi ne, %18, %c0_i32_13 : i32
    scf.if %19 {
      %c0_14 = arith.constant 0 : index
      %c0_15 = arith.constant 0 : index
      %20 = vector.load %arg8[%c0_14, %c0_15] : memref<1x128xf32, #tpu.memory_space<vmem>>, vector<1x128xf32>
      %cst_16 = arith.constant 3.906250e-03 : f32
      %21 = vector.broadcast %cst_16 : f32 to vector<1x128xf32>
      %22 = arith.mulf %20, %21 : vector<1x128xf32>
      %c0_17 = arith.constant 0 : index
      %c0_18 = arith.constant 0 : index
      %23 = vector.load %arg5[%c0_17, %c0_18] : memref<128x128xf32, #tpu.memory_space<vmem>>, vector<128x128xf32>
      %cst_19 = arith.constant dense<0.000000e+00> : vector<1x128xf32>
      %24 = tpu.matmul %22, %23, %cst_19 {dimension_numbers = #tpu.dot_dimension_numbers<[1], [0], [0], [1], [0, 0, 1, 1], [], []>} : vector<1x128xf32>, vector<128x128xf32>, vector<1x128xf32> -> vector<1x128xf32>
      %c0_20 = arith.constant 0 : index
      %c0_21 = arith.constant 0 : index
      %25 = vector.load %arg6[%c0_20, %c0_21] : memref<1x128xf32, #tpu.memory_space<vmem>>, vector<1x128xf32>
      %26 = arith.addf %24, %25 : vector<1x128xf32>
      %27 = vector.shape_cast %26 : vector<1x128xf32> to vector<1x1x128xf32>
      %c0_22 = arith.constant 0 : index
      %c0_23 = arith.constant 0 : index
      %c0_24 = arith.constant 0 : index
      %28 = vector.load %arg7[%c0_22, %c0_23, %c0_24] : memref<1x1x128xf32, #tpu.memory_space<vmem>>, vector<1x1x128xf32>
      tpu.vector_store %arg7[%c0_22, %c0_23, %c0_24], %27 {strides = array<i32>} : memref<1x1x128xf32, #tpu.memory_space<vmem>>, vector<1x1x128xf32>,
    } else {
    }
    return
  }
  func.func @transform_0(%arg0: i32, %arg1: i32) -> (i32, i32, i32) {
    %c0_i32 = arith.constant 0 : i32
    %c0_i32_0 = arith.constant 0 : i32
    return %arg0, %arg1, %c0_i32 : i32, i32, i32
  }
  func.func @transform_1(%arg0: i32, %arg1: i32) -> (i32, i32) {
    %c0_i32 = arith.constant 0 : i32
    %c0_i32_0 = arith.constant 0 : i32
    %c0_i32_1 = arith.constant 0 : i32
    return %c0_i32, %c0_i32_0 : i32, i32
  }
  func.func @transform_2(%arg0: i32, %arg1: i32) -> (i32, i32) {
    %c0_i32 = arith.constant 0 : i32
    %c0_i32_0 = arith.constant 0 : i32
    %c0_i32_1 = arith.constant 0 : i32
    return %c0_i32, %c0_i32_0 : i32, i32
  }
  func.func @transform_3(%arg0: i32, %arg1: i32) -> (i32, i32) {
    %c0_i32 = arith.constant 0 : i32
    %c0_i32_0 = arith.constant 0 : i32
    %c0_i32_1 = arith.constant 0 : i32
    return %c0_i32, %c0_i32_0 : i32, i32
  }
  func.func @transform_4(%arg0: i32, %arg1: i32) -> (i32, i32) {
    %c0_i32 = arith.constant 0 : i32
    %c0_i32_0 = arith.constant 0 : i32
    %c0_i32_1 = arith.constant 0 : i32
    return %c0_i32, %c0_i32_0 : i32, i32
  }
  func.func @transform_5(%arg0: i32, %arg1: i32) -> (i32, i32, i32) {
    %c0_i32 = arith.constant 0 : i32
    %c0_i32_0 = arith.constant 0 : i32
    %c0_i32_1 = arith.constant 0 : i32
    return %arg0, %c0_i32, %c0_i32_0 : i32, i32, i32
  }
}

</mosaic_0001>

<bundles_post_ra>
// kernel: tpu_custom_call.1
= control target key start
LH: loop header
LB: loop body
LE: loop exit
PB: predicated region body
PF: predicated region fallthrough
CT: control target
= control target key end

     0   :  { %s1408_s0 = inlined_call_operand.hbm [shape: bf16[2,256,128], index: 0, kind: input, shape index: {}]   ;;  %s1409_s1 = inlined_call_operand.hbm [shape: bf16[128,128], index: 1, kind: input, shape index: {}]   ;;  %s1410_s2 = inlined_call_operand.vmem [shape: f32[1,128], index: 2, kind: input, shape index: {}]   ;;  %s1411_s3 = inlined_call_operand.hbm [shape: f32[128,128], index: 3, kind: input, shape index: {}]   ;;  %s1412_s4 = inlined_call_operand.vmem [shape: f32[1,128], index: 4, kind: input, shape index: {}]   ;;  %s1413_s5 = inlined_call_operand.hbm [shape: f32[2,1,128], index: 5, kind: output, shape index: {}]  }
   0x1   :  { %1422 = sst [smem:[#allocation19_spill]] %s1409_s1 }
   0x2   :  { %1423 = sst [smem:[#allocation20_spill]] %s1410_s2 }
   0x3   :  { %1424 = sst [smem:[#allocation21_spill]] %s1411_s3 }
   0x4   :  { %1425 = sst [smem:[#allocation22_spill]] %s1412_s4 }
   0x5   :  { %1426 = sst [smem:[#allocation23_spill]] %s1413_s5 }
   0x6   :  { %10 = vsyncpa [#allocation4], 0 }
   0x7   :  { %12 = vsyncpa [#allocation4 + $0x1], 0 }
   0x8   :  { %13 = vsyncpa [#allocation7], 0 }
   0x9   :  { %14 = vsyncpa [#allocation5], 0 }
   0xa   :  { %16 = vsyncpa [#allocation5 + $0x1], 0  ;;  %s1182_s18 = smov 0   ;;  %s1184_s19 = smov 0  }
   0xb   :  { %s1186_s20 = smov 0   ;;  %s1188_s21 = smov 0  }
   0xc   :  { %s1190_s22 = smov 0   ;;  %s1192_s23 = smov 0  }
   0xd   :  { %s1194_s24 = smov 0   ;;  %s1196_s25 = smov 0  }
   0xe   :  { %s1198_s26 = smov 0   ;;  %s1200_s27 = smov 0  }
   0xf   :  { %s1202_s28 = smov 0  }
  0x10 LB: > { %1427 = sst [smem:[#allocation13_spill]] %s1103_s18  ;;  %s676_s29 = sadd.s32 4294967295, %s1143_s28   ;;  %s1143_s28 = sphi %s1202_s28, %s22_s28   ;;  %s1139_s27 = sphi %s1200_s27, %s1462_s27   ;;  %s1135_s26 = sphi %s1198_s26, %s1461_s26   ;;  %s1131_s25 = sphi %s1196_s25, %s1460_s25   ;;  %s1127_s24 = sphi %s1194_s24, %s1459_s24   ;;  %s1123_s23 = sphi %s1192_s23, %s1458_s23   ;;  %s1119_s22 = sphi %s1190_s22, %s1457_s22   ;;  %s1115_s21 = sphi %s1188_s21, %s1456_s21   ;;  %s1111_s20 = sphi %s1186_s20, %s1455_s20   ;;  %s1107_s19 = sphi %s1184_s19, %s1454_s19   ;;  %s1103_s18 = sphi %s1182_s18, %s1453_s18  }
  0x11   : > { %1428 = sst [smem:[#allocation14_spill]] %s1127_s24  ;;  %s677_s30 = sadd.s32 4294967294, %s1143_s28  }
  0x12   : > { %1429 = sst [smem:[#allocation15_spill]] %s1131_s25  ;;  %p56_p0 = scmp.ne.s32.totalorder %s1119_s22, %s1115_s21 }
  0x13   : > { %p1238_p1 = scmp.eq.s32.totalorder %s676_s29, 0  ;;  %p163_p2 = scmp.ne.s32.totalorder %s1111_s20, %s1107_s19 }
  0x14   : > { %p164_p3 = scmp.eq.s32.totalorder %s676_s29, 3  ;;  %p169_p5 = scmp.ne.s32.totalorder %s1107_s19, %s1103_s18 }
  0x15   : > { %p1246_p4 = por %p1238_p1, %p56_p0  ;;  %p170_p7 = scmp.eq.s32.totalorder %s677_s30, 3 }
  0x16   : > { %p1252_p6 = por %p164_p3, %p163_p2  ;;  %p678_p8 = scmp.ge.s32.totalorder %s1143_s28, 1 }
  0x17   : > { %p177_p9 = scmp.lt.s32.totalorder %s1143_s28, 5  ;;  %p1258_p10 = por %p170_p7, %p169_p5 }
  0x18   : > { %s1432_s8 = scalar_select %p1252_p6, 1, 0 }
  0x19   : > { %s1434_s9 = scalar_select %p1258_p10, 1, 0 }
  0x1a   : > { %1433 = sst [smem:[#allocation16_spill]] %s1432_s8  ;;  %p1262_p11 = pnand %p678_p8, %p177_p9 }
  0x1b   : > { %1435 = sst [smem:[#allocation17_spill]] %s1434_s9  ;;  %s1145_s14 = smov [#allocation6]  }
  0x1c   : > { %s1437_s1 = sld [smem:[#allocation19_spill]]  ;;  %p810_p12 = pneg %p1262_p11 }
  0x1d   : > { %s190_s15 = sshll.u32 %s1145_s14, 4  ;;  %s1438_s3 = sld [smem:[#allocation21_spill]]  ;;  %s191_s15 = int_to_ptr.vmem [resolvable:$true] %s190_s15 }
  0x1e   : > { %p811_p13 = pnand %p810_p12, %p1238_p1  ;;  %s1414_s29 = smov 64  }
  0x1f   : > { %s1415_s30 = smov 4   ;;  %s1148_s11 = smov [#allocation8]  }
  0x20   : > { %s207_s12 = sshll.u32 %s1148_s11, 4  ;;  %s1149_s14 = smov 128   ;;  %s208_s12 = int_to_ptr.vmem [resolvable:$true] %s207_s12 }
  0x21   : > { %s1150_s16 = smov 8   ;;  %s31_s17 = sadd.s32 1, %s1135_s26 }
  0x22   : > { %s188_s13 = sshll.u32 %s1437_s1, 4  ;;  %p32_p0 = scmp.ge.s32.totalorder %s31_s17, 2  ;;  %s189_s13 = int_to_ptr.hbm [resolvable:$true] %s188_s13 }
  0x23   : > { %s205_s21 = sshll.u32 %s1438_s3, 4  ;;  %s34_s1 = sadd.s32 1, %s1139_s27  ;;  %s206_s21 = int_to_ptr.hbm [resolvable:$true] %s205_s21 }
  0x24   : > { %813 = dma.hbm_to_vmem [thread:$0]  (!%p811_p13), %s189_s13, 1024, %s191_s15, [#allocation7], %s1414_s29, %s1414_s29, %s1415_s30  }
  0x25   : > { %816 = dma.hbm_to_vmem [thread:$0]  (!%p811_p13), %s206_s21, 2048, %s208_s12, [#allocation7], %s1149_s14, %s1149_s14, %s1150_s16  }
  0x26   : > { %s43_s3 = sadd.s32 1, %s1123_s23  ;;  %p50_p2 = scmp.ne.s32.totalorder %s1123_s23, %s1119_s22 }
  0x27   : > { %s1464_s17 = smov (%p32_p0, %s31_s17), 0  ;;  %s1466_s1 = smov (!%p32_p0, %s34_s1), %s1139_s27 }
  0x28   : > { %1439 = sst [smem:[#allocation18_spill]] %s1464_s17  ;;  %s39_s13 = ssub.s32 %s1135_s26, %s1464_s17 }
  0x29   : > { %p51_p3 = scmp.eq.s32.totalorder %s1143_s28, 0  ;;  %p36_p5 = scmp.ge.s32.totalorder %s1466_s1, 2 }
  0x2a   : > { %s153_s15 = sadd.s32 1, %s1111_s20  ;;  %p827_p8 = scmp.lt.s32.totalorder %s1143_s28, 4 }
  0x2b   : > { %p1291_p7 = por %p51_p3, %p50_p2  ;;  %s1468_s1 = smov (%p36_p5, %s1466_s1), 0 }
  0x2c   : > { %s224_s11 = sand.u32 1, %s1123_s23   ;;  %s683_s12 = sshll.u32 %s1135_s26, 4 }
  0x2d   : > { %s38_s14 = ssub.s32 %s1139_s27, %s1468_s1  ;;  %s682_s29 = sshll.u32 %s224_s11, 6 }
  0x2e   : > { %s40_s16 = sor.u32 %s39_s13, %s38_s14  ;;  %p151_p9 = scmp.eq.s32.totalorder %s38_s14, 0 }
  0x2f   : > { %p41_p12 = scmp.eq.s32.totalorder %s40_s16, 0  ;;  %s684_s9 = sshll.u32 %s1139_s27, 5 }
  0x30   : > { %s1303_s30 = scalar_select %p151_p9, %s1111_s20, %s153_s15  }
  0x31   : > { %s1306_s17 = scalar_select %p41_p12, %s1123_s23, %s43_s3  }
  0x32   : > { %s233_s18 = sadd.s32 %s684_s9, %s683_s12  ;;  %s228_s8 = scalar_lea.vmem [#allocation3], %s682_s29 }
  0x33   : > { %s238_s5 = sshll.u32 %s228_s8, 4  ;;  %s685_s25 = sshll.u32 %s233_s18, 2  ;;  %s239_s5 = int_to_ptr.vmem [resolvable:$true] %s238_s5 }
  0x34   : > { %s235_s24 = scalar_lea.hbm %s1408_s0, %s685_s25  ;;  %p818_p13 = pnand %p827_p8, %p1291_p7 }
  0x35   : > { %s236_s13 = sshll.u32 %s235_s24, 4  ;;  %s225_s14 = scalar_lea.sflag [#allocation4], %s224_s11  ;;  %s237_s13 = int_to_ptr.hbm [resolvable:$true] %s236_s13 }
  0x36   : > { %s1441_s15 = smov 4   ;;  %s1442_s16 = smov 64  }
  0x37   : > { %820 = dma.hbm_to_vmem [thread:$0]  (!%p818_p13), %s237_s13, 1024, %s239_s5, %s225_s14, %s1442_s16, %s1442_s16, %s1441_s15  }
  0x38   : > { %250 = sbr.rel (%p1262_p11) target bundleno = 488 (0x1e8), region = 40  ;;  %s252_s3 = sand.u32 (!%p1262_p11), 1, %s1119_s22  }
  0x39   : > { %s687_s18 = sshll.u32 (!%p1262_p11), %s252_s3, 6  ;;  %s253_s8 = scalar_lea.sflag (!%p1262_p11), [#allocation4], %s252_s3 }
  0x3a   : > { %s1322_s2 = scalar_lea.vmem (!%p1262_p11), [#allocation3], %s687_s18 }
  0x3d   : > { %1090 = dma.done.wait (%p1246_p4), %s253_s8, 1024  }
  0x3e   : > { %1092 = vsyncadd (%p1246_p4), %s253_s8, 4294966272 }
  0x3f   : > { %1094 = dma.done.wait (%p1238_p1), [#allocation7], 3072  }
  0x40   : > { %1096 = vsyncadd (%p1238_p1), [#allocation7], 4294964224  ;;  %s291_s4 = sand.u32 1, %s1107_s19   ;;  %s1443_s24 = sld [smem:[#allocation14_spill]] }
  0x41   : > { %s1335_s5 = scalar_lea.vmem [#allocation9], %s291_s4 }
  0x46   : > { %p690_p11 = scmp.ne.s32.totalorder %s1443_s24, 0 }
  0x48   : > { %297 = sbr.rel (%p690_p11) target bundleno = 79 (0x4f), region = 56 }
  0x4d   : > { %v1151_v0 = vmov 0.0  }
  0x4e   : > { %298 = vst [vmem:[#allocation2] sm:$0x1] %v1151_v0 }
  0x4f PF: > { %v773_v1 = vld [vmem:[#allocation6 + $0x38] sm:$0xff]  ;;  %v772_v2 = vld [vmem:[#allocation6 + $0x30] sm:$0xff]  ;;  %v771_v3 = vld [vmem:[#allocation6 + $0x28] sm:$0xff]  ;;  %s1444_s7 = sld [smem:[#allocation20_spill]] }
  0x50   : > { %431 = vmatpush.bf16.msra.mxu0 %v773_v1  ;;  %774 = vmatpush.bf16.msra.mxu1 %v773_v1  ;;  %v770_v4 = vld [vmem:[#allocation6 + $0x20] sm:$0xff]  ;;  %v769_v5 = vld [vmem:[#allocation6 + $0x18] sm:$0xff]  ;;  %v768_v6 = vld [vmem:[#allocation6 + $0x10] sm:$0xff]  ;;  %s1445_s9 = sld [smem:[#allocation14_spill]] }
  0x51   : > { %775 = vmatpush.bf16.msra.mxu2 %v773_v1  ;;  %776 = vmatpush.bf16.msra.mxu3 %v773_v1  ;;  %v767_v7 = vld [vmem:[#allocation6 + $0x8] sm:$0xff]  ;;  %v766_v8 = vld [vmem:[#allocation6] sm:$0xff]  ;;  %v760_v10 = vld [vmem:[%s1322_s2 + $0x10] sm:$0xff] }
  0x52   : > { %v758_v9 = vld [vmem:[%s1322_s2] sm:$0xff]  ;;  %v764_v12 = vld [vmem:[%s1322_s2 + $0x30] sm:$0xff]  ;;  %v759_v13 = vld [vmem:[%s1322_s2 + $0x8] sm:$0xff] }
  0x53   : > { %v762_v11 = vld [vmem:[%s1322_s2 + $0x20] sm:$0xff]  ;;  %v761_v14 = vld [vmem:[%s1322_s2 + $0x18] sm:$0xff]  ;;  %v763_v15 = vld [vmem:[%s1322_s2 + $0x28] sm:$0xff] }
  0x54   : > { %432 = vmatpush.bf16.msra.mxu0 %v772_v2  ;;  %777 = vmatpush.bf16.msra.mxu1 %v772_v2  ;;  %v765_v16 = vld [vmem:[%s1322_s2 + $0x38] sm:$0xff] }
  0x55   : > { %778 = vmatpush.bf16.msra.mxu2 %v772_v2  ;;  %779 = vmatpush.bf16.msra.mxu3 %v772_v2  ;;  %v926_v23 = vld [vmem:[%s1444_s7] ss:$0 sm:$0xff] }
  0x56   : > { %p755_p1 = scmp.ne.s32.totalorder %s1445_s9, 1 }
  0x57   : > { %s1446_s21 = sld [smem:[#allocation22_spill]] (!%p755_p1) }
  0x58   : > { %433 = vmatpush.bf16.msra.mxu0 %v771_v3  ;;  %780 = vmatpush.bf16.msra.mxu1 %v771_v3 }
  0x59   : > { %781 = vmatpush.bf16.msra.mxu2 %v771_v3  ;;  %782 = vmatpush.bf16.msra.mxu3 %v771_v3 }
  0x5c   : > { %434 = vmatpush.bf16.msra.mxu0 %v770_v4  ;;  %783 = vmatpush.bf16.msra.mxu1 %v770_v4 }
  0x5d   : > { %784 = vmatpush.bf16.msra.mxu2 %v770_v4  ;;  %785 = vmatpush.bf16.msra.mxu3 %v770_v4 }
  0x60   : > { %435 = vmatpush.bf16.msra.mxu0 %v769_v5  ;;  %786 = vmatpush.bf16.msra.mxu1 %v769_v5 }
  0x61   : > { %787 = vmatpush.bf16.msra.mxu2 %v769_v5  ;;  %788 = vmatpush.bf16.msra.mxu3 %v769_v5 }
  0x64   : > { %436 = vmatpush.bf16.msra.mxu0 %v768_v6  ;;  %789 = vmatpush.bf16.msra.mxu1 %v768_v6 }
  0x65   : > { %790 = vmatpush.bf16.msra.mxu2 %v768_v6  ;;  %791 = vmatpush.bf16.msra.mxu3 %v768_v6 }
  0x68   : > { %437 = vmatpush.bf16.msra.mxu0 %v767_v7  ;;  %792 = vmatpush.bf16.msra.mxu1 %v767_v7 }
  0x69   : > { %793 = vmatpush.bf16.msra.mxu2 %v767_v7  ;;  %794 = vmatpush.bf16.msra.mxu3 %v767_v7 }
  0x6c   : > { %438 = vmatpush.bf16.msra.mxu0 %v766_v8  ;;  %795 = vmatpush.bf16.msra.mxu1 %v766_v8 }
  0x6d   : > { %796 = vmatpush.bf16.msra.mxu2 %v766_v8  ;;  %797 = vmatpush.bf16.msra.mxu3 %v766_v8 }
  0x6f   : > { %439 = vmatmul.bf16.vlgmr.msra.gmra.mxu0 %v758_v9  ;;  %449 = vmatmul.bf16.vlgmr.msra.gmra.mxu1 %v760_v10 }
  0x70   : > { %459 = vmatmul.bf16.vlgmr.msra.gmra.mxu2 %v762_v11  ;;  %469 = vmatmul.bf16.vlgmr.msra.gmra.mxu3 %v764_v12 }
  0x7f   : > { %444 = vmatmul.bf16.gmra.mxu0 %v759_v13  ;;  %454 = vmatmul.bf16.gmra.mxu1 %v761_v14 }
  0x80   : > { %464 = vmatmul.bf16.gmra.mxu2 %v763_v15  ;;  %474 = vmatmul.bf16.gmra.mxu3 %v765_v16 }
  0xec   : > { %v440_v17 = vpop.f32.mrf.mxu0  ;;  %v450_v18 = vpop.f32.mrf.mxu1 }
  0xed   : > { %v441_v28 = vadd.f32 %v926_v23, %v440_v17  ;;  %v451_v35 = vadd.f32 %v926_v23, %v450_v18 }
  0xef   : > { %v480_v31 = vmax.f32 %v441_v28, 0.0  ;;  %v484_v43 = vmax.f32 %v451_v35, 0.0 }
  0xf3   : > { %v460_v19 = vpop.f32.mrf.mxu2  ;;  %v470_v22 = vpop.f32.mrf.mxu3 }
  0xf4   : > { %v442_v20 = vpop.f32.mrf.mxu0  ;;  %v452_v21 = vpop.f32.mrf.mxu1  ;;  %v461_v49 = vadd.f32 %v926_v23, %v460_v19  ;;  %v471_v63 = vadd.f32 %v926_v23, %v470_v22  ;;  %v496_v22 = vld [vmem:[#allocation2] sm:$0x1] }
  0xf5   : > { %v443_v26 = vadd.f32 %v926_v23, %v442_v20  ;;  %v453_v39 = vadd.f32 %v926_v23, %v452_v21 }
  0xf6   : > { %v488_v57 = vmax.f32 %v461_v49, 0.0  ;;  %v492_v6 = vmax.f32 %v471_v63, 0.0 }
  0xf7   : > { %v481_v30 = vmax.f32 %v443_v26, 0.0  ;;  %v485_v46 = vmax.f32 %v453_v39, 0.0 }
  0xf9   : > { %v497_v36 = vadd.f32 %v481_v30, %v480_v31 }
  0xfb   : > { %v462_v25 = vpop.f32.mrf.mxu2  ;;  %v472_v34 = vpop.f32.mrf.mxu3 }
  0xfc   : > { %v445_v24 = vpop.f32.mrf.mxu0  ;;  %v455_v27 = vpop.f32.mrf.mxu1  ;;  %v463_v53 = vadd.f32 %v926_v23, %v462_v25  ;;  %v473_v3 = vadd.f32 %v926_v23, %v472_v34 }
  0xfd   : > { %v446_v29 = vadd.f32 %v926_v23, %v445_v24  ;;  %v456_v44 = vadd.f32 %v926_v23, %v455_v27 }
  0xfe   : > { %v489_v60 = vmax.f32 %v463_v53, 0.0  ;;  %v493_v9 = vmax.f32 %v473_v3, 0.0 }
  0xff   : > { %v482_v32 = vmax.f32 %v446_v29, 0.0  ;;  %v486_v50 = vmax.f32 %v456_v44, 0.0 }
 0x101   : > { %v498_v40 = vadd.f32 %v497_v36, %v482_v32 }
 0x103   : > { %v465_v38 = vpop.f32.mrf.mxu2  ;;  %v475_v52 = vpop.f32.mrf.mxu3 }
 0x104   : > { %v447_v33 = vpop.f32.mrf.mxu0  ;;  %v457_v42 = vpop.f32.mrf.mxu1  ;;  %v466_v59 = vadd.f32 %v926_v23, %v465_v38  ;;  %v476_v8 = vadd.f32 %v926_v23, %v475_v52 }
 0x105   : > { %v448_v37 = vadd.f32 %v926_v23, %v447_v33  ;;  %v458_v48 = vadd.f32 %v926_v23, %v457_v42 }
 0x106   : > { %v490_v0 = vmax.f32 %v466_v59, 0.0  ;;  %v494_v12 = vmax.f32 %v476_v8, 0.0 }
 0x107   : > { %v483_v41 = vmax.f32 %v448_v37, 0.0  ;;  %v487_v54 = vmax.f32 %v458_v48, 0.0 }
 0x109   : > { %v499_v45 = vadd.f32 %v498_v40, %v483_v41 }
 0x10b   : > { %v500_v47 = vadd.f32 %v499_v45, %v484_v43  ;;  %v467_v56 = vpop.f32.mrf.mxu2  ;;  %v477_v5 = vpop.f32.mrf.mxu3 }
 0x10c   : > { %v468_v62 = vadd.f32 %v926_v23, %v467_v56  ;;  %v478_v11 = vadd.f32 %v926_v23, %v477_v5 }
 0x10d   : > { %v501_v51 = vadd.f32 %v500_v47, %v485_v46 }
 0x10e   : > { %v491_v4 = vmax.f32 %v468_v62, 0.0  ;;  %v495_v15 = vmax.f32 %v478_v11, 0.0 }
 0x10f   : > { %v502_v55 = vadd.f32 %v501_v51, %v486_v50 }
 0x111   : > { %v503_v58 = vadd.f32 %v502_v55, %v487_v54 }
 0x113   : > { %v504_v61 = vadd.f32 %v503_v58, %v488_v57 }
 0x115   : > { %v505_v1 = vadd.f32 %v504_v61, %v489_v60 }
 0x117   : > { %v506_v2 = vadd.f32 %v505_v1, %v490_v0 }
 0x119   : > { %v507_v7 = vadd.f32 %v506_v2, %v491_v4 }
 0x11b   : > { %v508_v10 = vadd.f32 %v507_v7, %v492_v6 }
 0x11d   : > { %v509_v13 = vadd.f32 %v508_v10, %v493_v9 }
 0x11f   : > { %v510_v14 = vadd.f32 %v509_v13, %v494_v12 }
 0x121   : > { %v511_v16 = vadd.f32 %v510_v14, %v495_v15 }
 0x123   : > { %v512_v17 = vrot.slane %v511_v16, 4 }
 0x125   : > { %v513_v18 = vadd.f32 %v512_v17, %v511_v16 }
 0x127   : > { %v514_v19 = vrot.slane %v513_v18, 2 }
 0x129   : > { %v515_v20 = vadd.f32 %v514_v19, %v513_v18 }
 0x12b   : > { %v516_v21 = vrot.slane %v515_v20, 1 }
 0x12d   : > { %v517_v24 = vadd.f32 %v516_v21, %v515_v20  ;;  %523 = sbr.rel (%p755_p1) target bundleno = 467 (0x1d3), region = 60 }
 0x12f   : > { %v518_v25 = vadd.f32 %v517_v24, %v496_v22 }
 0x131   : > { %519 = vst [vmem:[#allocation2] sm:$0x1] %v518_v25 }
 0x132   : > { %v541_v26 = vld [vmem:[#allocation8 + $0x78] sm:$0xff]  ;;  %v540_v27 = vld [vmem:[#allocation8 + $0x70] sm:$0xff]  ;;  %v539_v23 = vld [vmem:[#allocation8 + $0x68] sm:$0xff] }
 0x133   : > { %543 = vmatpush.msra.mxu0 %v541_v26  ;;  %v538_v28 = vld [vmem:[#allocation8 + $0x60] sm:$0xff]  ;;  %v537_v29 = vld [vmem:[#allocation8 + $0x58] sm:$0xff]  ;;  %v536_v30 = vld [vmem:[#allocation8 + $0x50] sm:$0xff] }
 0x134   : > { %v535_v31 = vld [vmem:[#allocation8 + $0x48] sm:$0xff]  ;;  %v534_v32 = vld [vmem:[#allocation8 + $0x40] sm:$0xff]  ;;  %v533_v33 = vld [vmem:[#allocation8 + $0x38] sm:$0xff] }
 0x135   : > { %544 = vmatpush.msra.mxu0 %v540_v27  ;;  %v532_v34 = vld [vmem:[#allocation8 + $0x30] sm:$0xff]  ;;  %v531_v35 = vld [vmem:[#allocation8 + $0x28] sm:$0xff]  ;;  %v530_v36 = vld [vmem:[#allocation8 + $0x20] sm:$0xff] }
 0x136   : > { %v529_v37 = vld [vmem:[#allocation8 + $0x18] sm:$0xff]  ;;  %v528_v38 = vld [vmem:[#allocation8 + $0x10] sm:$0xff]  ;;  %v527_v40 = vld [vmem:[#allocation8 + $0x8] sm:$0xff] }
 0x137   : > { %545 = vmatpush.msra.mxu0 %v539_v23  ;;  %v526_v41 = vld [vmem:[#allocation8] sm:$0xff]  ;;  %v542_v43 = vld [vmem:[%s1446_s21] sm:$0x1] }
 0x138   : > { %v524_v39 = vld [vmem:[#allocation2] sm:$0x1] }
 0x139   : > { %546 = vmatpush.msra.mxu0 %v538_v28  ;;  %v525_v42 = vmul.f32 0.00390625, %v524_v39 }
 0x13b   : > { %547 = vmatpush.msra.mxu0 %v537_v29 }
 0x13d   : > { %548 = vmatpush.msra.mxu0 %v536_v30 }
 0x13f   : > { %549 = vmatpush.msra.mxu0 %v535_v31 }
 0x141   : > { %550 = vmatpush.msra.mxu0 %v534_v32 }
 0x143   : > { %551 = vmatpush.msra.mxu0 %v533_v33 }
 0x145   : > { %552 = vmatpush.msra.mxu0 %v532_v34 }
 0x147   : > { %553 = vmatpush.msra.mxu0 %v531_v35 }
 0x149   : > { %554 = vmatpush.msra.mxu0 %v530_v36 }
 0x14b   : > { %555 = vmatpush.msra.mxu0 %v529_v37 }
 0x14d   : > { %556 = vmatpush.msra.mxu0 %v528_v38 }
 0x14f   : > { %557 = vmatpush.msra.mxu0 %v527_v40 }
 0x151   : > { %558 = vmatpush.msra.mxu0 %v526_v41 }
 0x152   : > { %559 = vmatmul.f32.vlgmr.msra.gmra.mxu0 %v525_v42 }
 0x1cf   : > { %v560_v44 = vpop.f32.mrf.mxu0 }
 0x1d0   : > { %v561_v45 = vadd.f32 %v560_v44, %v542_v43 }
 0x1d2   : > { %563 = vst [vmem:[%s1335_s5] sm:$0x1] %v561_v45 }
 0x1d3 PF: > { %s1447_s11 = sld [smem:[#allocation15_spill]]  ;;  %s575_s3 = sshll.u32 %s1335_s5, 4  ;;  %s576_s3 = int_to_ptr.vmem [resolvable:$true] %s575_s3 }
 0x1d4   : > { %s1448_s14 = sld [smem:[#allocation23_spill]]  ;;  %s565_s8 = scalar_lea.sflag [#allocation5], %s291_s4 }
 0x1da   : > { %s573_s16 = scalar_lea.hbm %s1448_s14, %s1447_s11  ;;  %s1037_s7 = scalar_lea.hbm %s1448_s14, 2 }
 0x1db   : > { %s577_s18 = sshll.u32 %s573_s16, 4  ;;  %s578_s18 = int_to_ptr.hbm [resolvable:$true] %s577_s18 }
 0x1dc   : > { %s1031_s2 = sshra.s32 %s578_s18, 4  ;;  %s1032_s2 = int_to_ptr.hbm [resolvable:$true] %s1031_s2 }
 0x1dd   : > { %s1033_s24 = scalar_lea.hbm %s1032_s2, 1  ;;  %p1038_p3 = scmp.lt.s32.totalorder %s1032_s2, %s1448_s14 }
 0x1de   : > { %p1034_p4 = scmp.ne.s32.totalorder %s1032_s2, %s1033_s24  ;;  %p1039_p5 = scmp.lt.s32.totalorder %s1037_s7, %s1033_s24 }
 0x1e0   : > { %p1035_p0 = pnand %p1034_p4, %p1252_p6  ;;  %p1040_p7 = por %p1039_p5, %p1038_p3 }
 0x1e2   : > { %p1036_p2 = pneg %p1035_p0 }
 0x1e4   : > { %p1041_p8 = pnand %p1040_p7, %p1036_p2 }
 0x1e6   : > { %1044 = shalt.err (!%p1041_p8)
}
 0x1e7   : > { %808 = dma.vmem_to_hbm [thread:$0]  (%p1252_p6), %s576_s3, 16, %s578_s18, %s565_s8  }
 0x1e8 PF: > { %s1450_s4 = sld [smem:[#allocation13_spill]]  ;;  %p830_p9 = scmp.ge.s32.totalorder %s1143_s28, 2 }
 0x1ea   : > { %p822_p12 = pnand %p830_p9, %p1258_p10 }
 0x1ec   : > { %p823_p13 = pneg %p822_p12 }
 0x1ee   : > { %s589_s29 = sand.u32 1, %s1450_s4  }
 0x1ef   : > { %s590_s21 = scalar_lea.sflag [#allocation5], %s589_s29 }
 0x1f0   : > { %1098 = dma.done.wait (%p823_p13), %s590_s21, 16  }
 0x1f1   : > { %1100 = vsyncadd (%p823_p13), %s590_s21, 4294967280  ;;  %s22_s28 = sadd.s32 1, %s1143_s28   ;;  %s1452_s11 = sld [smem:[#allocation18_spill]] }
 0x1f2   : > { %p19_p11 = scmp.ge.s32.totalorder %s22_s28, 6   ;;  %s1453_s18 = smov %s1107_s19 }
 0x1f3   : > { %s1454_s19 = smov %s1111_s20  ;;  %s1455_s20 = smov %s1303_s30 }
 0x1f4   : > { %s1456_s21 = smov %s1119_s22  ;;  %s1457_s22 = smov %s1123_s23 }
 0x1f5   : > { %s1458_s23 = smov %s1306_s17  ;;  %s1459_s24 = smov %s1135_s26 }
 0x1f6   : > { %s1460_s25 = smov %s1139_s27  ;;  %s1462_s27 = smov %s1468_s1 }
 0x1f7   : > { %s1461_s26 = smov %s1452_s11  ;;  %21 = sbr.rel (!%p19_p11) target bundleno = 16 (0x10), region = 101 }
 0x1fc   :  { %595 = vsyncpa [#allocation4], 1 }
 0x1fd   :  { %597 = vsyncpa [#allocation4 + $0x1], 1 }
 0x1fe   :  { %598 = vsyncpa [#allocation7], 1 }
 0x1ff   :  { %599 = vsyncpa [#allocation5], 1 }
 0x200   :  { %601 = vsyncpa [#allocation5 + $0x1], 1 }

</bundles_post_ra>
